<compile_context>
chip_gen: v6e
topology: v6e:2x2x1
jax: 0.10.0
libtpu: 0.0.40
codegen_flags: <defaults>
</compile_context>

<pallas_src>
import math

import jax
import jax.numpy as jnp
from jax.experimental import pallas as pl
from jax.experimental.pallas import tpu as pltpu


def _round_up(v, q):
    return (v + q - 1) // q * q


def _vmem_capacity_bytes():
    """Physical VMEM per TensorCore; conservative (v7x) default if unqueryable."""
    try:
        info = pltpu.get_tpu_info()
        cap = getattr(info, "vmem_capacity_bytes", None)
        if cap:
            return int(cap)
    except Exception:
        pass
    return 64 * 2**20


def _tile_vmem_bytes(rows, cols, dtype):
    """Layout-honest VMEM footprint: 128-lane / 8*(4/itemsize)-sublane padded."""
    itemsize = jnp.dtype(dtype).itemsize
    sublane = 8 * max(1, 4 // itemsize)          # 8 for f32, 16 for bf16
    return _round_up(rows, sublane) * _round_up(cols, 128) * itemsize


def _mosaic_matmul_kernel(x_ref, w_ref, b_ref, o_ref):
    # (tm, K) @ (K, N) on the MXU with f32 accumulation, fused bias add.
    x = x_ref[...]
    w = w_ref[...]
    if x.dtype != w.dtype:
        # In-kernel cast (VPU op on a resident VMEM tile): bf16 MXU rate on
        # v6e/v7x without an extra HBM pass over the activations.
        x = x.astype(w.dtype)
    acc = jnp.dot(x, w, preferred_element_type=jnp.float32)
    o_ref[...] = (acc + b_ref[...]).astype(o_ref.dtype)


def build_mosaic(bank, parts):
    """Glue (one-time, outside the hot path): assemble the block weight matrix.

    bank:  (num_parts, msize, msize);  parts: (icount, ocount) int32
    returns (icount*msize, ocount*msize)
    """
    icount, ocount = parts.shape
    msize = bank.shape[-1]
    tiles = bank[parts]                          # (icount, ocount, msize, msize)
    tiles = jnp.transpose(tiles, (0, 2, 1, 3))   # (icount, msize, ocount, msize)
    return tiles.reshape(icount * msize, ocount * msize)


def prepare_mosaic_weights(fc_mat, bias, idim, odim, *, pad_value=0.0,
                           weight_dtype=None):
    """One-time weight/bias prep — cache the result (like Mosaic._fc_mat in eval).

    * Slices fc_mat to the live (idim, odim) window: no K-pad of x, no post-slice.
    * Folds a nonzero pad_value contribution into the bias (pure algebra).
    * Lane-pads the output width to a multiple of 128 only when odim >= 128.
    * Optionally casts the *weight* to bf16 (activations are cast in-kernel).
    """
    kpad = fc_mat.shape[0]
    w = fc_mat[:idim, :odim]
    b = jnp.zeros((odim,), jnp.float32) if bias is None else bias.astype(jnp.float32)
    if kpad > idim and pad_value not in (None, 0, 0.0):
        # pad(x) columns are the constant pad_value: fold their matmul
        # contribution into the bias instead of materializing a padded x.
        b = b + float(pad_value) * jnp.sum(
            fc_mat[idim:, :odim].astype(jnp.float32), axis=0)
    n_out = odim
    if odim >= 128 and odim % 128 != 0:
        # Lane-dense (unmasked vst) output is worth a few zero columns once the
        # output is wide; for tiny odim the ragged store is cheaper.
        n_out = _round_up(odim, 128)
        w = jnp.pad(w, ((0, 0), (0, n_out - odim)))
        b = jnp.pad(b, ((0, n_out - odim),))
    if weight_dtype is not None:
        w = w.astype(weight_dtype)
    return w, b.reshape(1, n_out)


def mosaic_forward(x, w, b, odim, *, tm=512, out_dtype=None):
    """y = Mosaic.forward(x) with post=Identity, using prepared (w, b)."""
    idim = x.shape[-1]
    k_dim, n_out = w.shape
    assert k_dim == idim, "prepared weight K must equal x feature dim"
    if out_dtype is None:
        out_dtype = x.dtype

    lead_shape = x.shape[:-1]
    m = int(math.prod(lead_shape)) if lead_shape else 1
    x2 = x.reshape(m, idim)

    vmem_cap = _vmem_capacity_bytes()
    # v7x proxy: 64 MiB VMEM/TC and 2 TensorCores per chip.
    multi_core = vmem_cap < 96 * 2**20
    vmem_ceiling = (100 * 2**20) if vmem_cap >= 96 * 2**20 else (48 * 2**20)

    # Row tile: as large as fits, MXU-height aligned when big; prefer >= 2 grid
    # steps only on multi-TC chips (single-TC grids are serial loops).
    tm_eff = max(8, min(int(tm), _round_up(m, 8)))
    if tm_eff >= 256:
        tm_eff = (tm_eff // 256) * 256
    if multi_core and m >= 16 and pl.cdiv(m, tm_eff) < 2:
        tm_eff = max(8, _round_up(pl.cdiv(m, 2), 8))
    grid_m = pl.cdiv(m, tm_eff)   # ragged last block OK: OOB output rows discarded

    cost = pl.CostEstimate(
        flops=2 * m * k_dim * n_out,
        transcendentals=0,
        bytes_accessed=(m * k_dim * jnp.dtype(x2.dtype).itemsize
                        + k_dim * n_out * jnp.dtype(w.dtype).itemsize
                        + n_out * jnp.dtype(b.dtype).itemsize
                        + m * n_out * jnp.dtype(out_dtype).itemsize),
    )

    def build(single_buffer_resident):
        wbuf = 1 if single_buffer_resident else 2
        vmem_bytes = (2 * _tile_vmem_bytes(tm_eff, k_dim, x2.dtype)
                      + 2 * _tile_vmem_bytes(tm_eff, n_out, out_dtype)
                      + wbuf * _tile_vmem_bytes(k_dim, n_out, w.dtype)
                      + wbuf * _tile_vmem_bytes(1, n_out, b.dtype)
                      + (2 << 20))
        vmem_limit = int(min(max(vmem_bytes, 16 * 2**20), vmem_ceiling))
        if single_buffer_resident:
            # Grid-invariant operands: DMA'd once, so single-buffer to halve
            # their VMEM footprint (matters most on v7x's 64 MiB VMEM).
            w_spec = pl.BlockSpec((k_dim, n_out), lambda i: (0, 0),
                                  pipeline_mode=pl.Buffered(1))
            b_spec = pl.BlockSpec((1, n_out), lambda i: (0, 0),
                                  pipeline_mode=pl.Buffered(1))
        else:
            w_spec = pl.BlockSpec((k_dim, n_out), lambda i: (0, 0))
            b_spec = pl.BlockSpec((1, n_out), lambda i: (0, 0))
        return pl.pallas_call(
            _mosaic_matmul_kernel,
            out_shape=jax.ShapeDtypeStruct((m, n_out), out_dtype),
            grid_spec=pltpu.PrefetchScalarGridSpec(
                num_scalar_prefetch=0,
                grid=(grid_m,),
                in_specs=[
                    pl.BlockSpec((tm_eff, k_dim), lambda i: (i, 0)),  # x rows tile
                    w_spec,                                           # resident weight
                    b_spec,                                           # bias row
                ],
                out_specs=pl.BlockSpec((tm_eff, n_out), lambda i: (i, 0)),
            ),
            compiler_params=pltpu.CompilerParams(
                dimension_semantics=("parallel",),
                vmem_limit_bytes=vmem_limit,
            ),
            cost_estimate=cost,
        )

    try:
        out = build(True)(x2, w, b)
    except Exception:
        # pipeline_mode / pl.Buffered(1) unsupported on this jax build: fall back
        # to default (double-buffered) specs — identical math.
        out = build(False)(x2, w, b)

    if n_out != odim:
        out = out[:, :odim]
    return out.reshape(*lead_shape, odim)


if __name__ == "__main__":
    # Module hyper-params (consistent with Mosaic.__init__ semantics).
    idim, odim, msize = 30, 20, 8
    icount = (idim + msize - 1) // msize   # 4  -> kpad = 32
    ocount = (odim + msize - 1) // msize   # 3  -> mosaic width 24
    num_parts = 6                          # size of the shared tile bank

    key = jax.random.PRNGKey(0)
    k_bank, k_parts, k_bias, k_x, k_xr = jax.random.split(key, 5)

    # Deterministic synthetic parameters (stand-in for mmgr.build_modules / parts).
    bank = jax.random.normal(k_bank, (num_parts, msize, msize), jnp.float32) * 0.1
    parts = jax.random.randint(k_parts, (icount, ocount), 0, num_parts, dtype=jnp.int32)
    bound = 1.0 / math.sqrt(odim)
    bias = jax.random.uniform(k_bias, (odim,), jnp.float32, minval=-bound, maxval=bound)

    fc_mat = build_mosaic(bank, parts)     # (32, 24) — built once (eval-mode caching)

    batch, seq = 4, 128
    x = jax.random.normal(k_x, (batch, seq, idim), jnp.float32)

    def reference(xx, pad_value=0.0):
        pad = [(0, 0)] * (xx.ndim - 1) + [(0, icount * msize - idim)]
        x_pad = jnp.pad(xx, pad, constant_values=pad_value)
        return (x_pad @ fc_mat)[..., :odim] + bias

    # --- f32 path (pad_value = 0): kernel never sees padded x -------------------
    w32, b32 = prepare_mosaic_weights(fc_mat, bias, idim, odim)
    y = jax.block_until_ready(mosaic_forward(x, w32, b32, odim))
    assert y.shape == (batch, seq, odim)
    assert jnp.allclose(y, reference(x), atol=1e-4, rtol=1e-4)

    # --- nonzero pad_value folded into the bias (no padded x materialized) ------
    wpv, bpv = prepare_mosaic_weights(fc_mat, bias, idim, odim, pad_value=1.5)
    y_pv = jax.block_until_ready(mosaic_forward(x, wpv, bpv, odim))
    assert jnp.allclose(y_pv, reference(x, pad_value=1.5), atol=1e-4, rtol=1e-4)

    # --- bf16 weight (cast cached outside hot path; x cast in-kernel) -----------
    wbf, bbf = prepare_mosaic_weights(fc_mat, bias, idim, odim,
                                      weight_dtype=jnp.bfloat16)
    y_bf = jax.block_until_ready(mosaic_forward(x, wbf, bbf, odim))
    assert y_bf.shape == (batch, seq, odim)
    assert jnp.allclose(y_bf, reference(x), atol=5e-2, rtol=5e-2)

    # --- ragged M (grid does not divide rows): OOB output rows discarded --------
    x_rag = jax.random.normal(k_xr, (3, 100, idim), jnp.float32)   # M = 300
    y_rag = jax.block_until_ready(mosaic_forward(x_rag, w32, b32, odim))
    assert y_rag.shape == (3, 100, odim)
    assert jnp.allclose(y_rag, reference(x_rag), atol=1e-4, rtol=1e-4)

    print("KERNEL_OK")
</pallas_src>

<mosaic_0001>
module attributes {stable_mosaic.version = 11 : i64} {
  func.func @_mosaic_matmul_kernel(%arg0: i32, %arg1: memref<256x30xf32, #tpu.memory_space<vmem>>, %arg2: memref<30x20xf32, #tpu.memory_space<vmem>>, %arg3: memref<1x20xf32, #tpu.memory_space<vmem>>, %arg4: memref<256x20xf32, #tpu.memory_space<vmem>>) attributes {dimension_semantics = [#tpu.dimension_semantics<parallel>], iteration_bounds = array<i64: 2>, scalar_prefetch = 0 : i64, scratch_operands = 0 : i64, tpu.core_type = #tpu.core_type<tc>, window_params = [{transform_indices = @transform_0, window_bounds = array<i64: 256, 30>}, {pipeline_mode = #tpu.pipeline_mode<synchronous>, transform_indices = @transform_1, window_bounds = array<i64: 30, 20>}, {pipeline_mode = #tpu.pipeline_mode<synchronous>, transform_indices = @transform_2, window_bounds = array<i64: 1, 20>}, {transform_indices = @transform_3, window_bounds = array<i64: 256, 20>}]} {
    %c0 = arith.constant 0 : index
    %c0_0 = arith.constant 0 : index
    %0 = vector.load %arg1[%c0, %c0_0] : memref<256x30xf32, #tpu.memory_space<vmem>>, vector<256x30xf32>
    %c0_1 = arith.constant 0 : index
    %c0_2 = arith.constant 0 : index
    %1 = vector.load %arg2[%c0_1, %c0_2] : memref<30x20xf32, #tpu.memory_space<vmem>>, vector<30x20xf32>
    %cst = arith.constant dense<0.000000e+00> : vector<256x20xf32>
    %2 = tpu.matmul %0, %1, %cst {dimension_numbers = #tpu.dot_dimension_numbers<[1], [0], [0], [1], [0, 0, 1, 1], [], []>} : vector<256x30xf32>, vector<30x20xf32>, vector<256x20xf32> -> vector<256x20xf32>
    %c0_3 = arith.constant 0 : index
    %c0_4 = arith.constant 0 : index
    %3 = vector.load %arg3[%c0_3, %c0_4] : memref<1x20xf32, #tpu.memory_space<vmem>>, vector<1x20xf32>
    %4 = vector.broadcast %3 : vector<1x20xf32> to vector<256x20xf32>
    %5 = arith.addf %2, %4 : vector<256x20xf32>
    %c0_5 = arith.constant 0 : index
    %c0_6 = arith.constant 0 : index
    %6 = vector.load %arg4[%c0_5, %c0_6] : memref<256x20xf32, #tpu.memory_space<vmem>>, vector<256x20xf32>
    tpu.vector_store %arg4[%c0_5, %c0_6], %5 {strides = array<i32>} : memref<256x20xf32, #tpu.memory_space<vmem>>, vector<256x20xf32>,
    return
  }
  func.func @transform_0(%arg0: i32) -> (i32, i32) {
    %c0_i32 = arith.constant 0 : i32
    %c0_i32_0 = arith.constant 0 : i32
    return %arg0, %c0_i32 : i32, i32
  }
  func.func @transform_1(%arg0: i32) -> (i32, i32) {
    %c0_i32 = arith.constant 0 : i32
    %c0_i32_0 = arith.constant 0 : i32
    %c0_i32_1 = arith.constant 0 : i32
    return %c0_i32, %c0_i32_0 : i32, i32
  }
  func.func @transform_2(%arg0: i32) -> (i32, i32) {
    %c0_i32 = arith.constant 0 : i32
    %c0_i32_0 = arith.constant 0 : i32
    %c0_i32_1 = arith.constant 0 : i32
    return %c0_i32, %c0_i32_0 : i32, i32
  }
  func.func @transform_3(%arg0: i32) -> (i32, i32) {
    %c0_i32 = arith.constant 0 : i32
    %c0_i32_0 = arith.constant 0 : i32
    return %arg0, %c0_i32 : i32, i32
  }
}

module attributes {stable_mosaic.version = 11 : i64} {
  func.func @_mosaic_matmul_kernel(%arg0: i32, %arg1: memref<256x30xf32, #tpu.memory_space<vmem>>, %arg2: memref<30x20xf32, #tpu.memory_space<vmem>>, %arg3: memref<1x20xf32, #tpu.memory_space<vmem>>, %arg4: memref<256x20xf32, #tpu.memory_space<vmem>>) attributes {dimension_semantics = [#tpu.dimension_semantics<parallel>], iteration_bounds = array<i64: 2>, scalar_prefetch = 0 : i64, scratch_operands = 0 : i64, tpu.core_type = #tpu.core_type<tc>, window_params = [{transform_indices = @transform_0, window_bounds = array<i64: 256, 30>}, {pipeline_mode = #tpu.pipeline_mode<synchronous>, transform_indices = @transform_1, window_bounds = array<i64: 30, 20>}, {pipeline_mode = #tpu.pipeline_mode<synchronous>, transform_indices = @transform_2, window_bounds = array<i64: 1, 20>}, {transform_indices = @transform_3, window_bounds = array<i64: 256, 20>}]} {
    %c0 = arith.constant 0 : index
    %c0_0 = arith.constant 0 : index
    %0 = vector.load %arg1[%c0, %c0_0] : memref<256x30xf32, #tpu.memory_space<vmem>>, vector<256x30xf32>
    %c0_1 = arith.constant 0 : index
    %c0_2 = arith.constant 0 : index
    %1 = vector.load %arg2[%c0_1, %c0_2] : memref<30x20xf32, #tpu.memory_space<vmem>>, vector<30x20xf32>
    %cst = arith.constant dense<0.000000e+00> : vector<256x20xf32>
    %2 = tpu.matmul %0, %1, %cst {dimension_numbers = #tpu.dot_dimension_numbers<[1], [0], [0], [1], [0, 0, 1, 1], [], []>} : vector<256x30xf32>, vector<30x20xf32>, vector<256x20xf32> -> vector<256x20xf32>
    %c0_3 = arith.constant 0 : index
    %c0_4 = arith.constant 0 : index
    %3 = vector.load %arg3[%c0_3, %c0_4] : memref<1x20xf32, #tpu.memory_space<vmem>>, vector<1x20xf32>
    %4 = vector.broadcast %3 : vector<1x20xf32> to vector<256x20xf32>
    %5 = arith.addf %2, %4 : vector<256x20xf32>
    %c0_5 = arith.constant 0 : index
    %c0_6 = arith.constant 0 : index
    %6 = vector.load %arg4[%c0_5, %c0_6] : memref<256x20xf32, #tpu.memory_space<vmem>>, vector<256x20xf32>
    tpu.vector_store %arg4[%c0_5, %c0_6], %5 {strides = array<i32>} : memref<256x20xf32, #tpu.memory_space<vmem>>, vector<256x20xf32>,
    return
  }
  func.func @transform_0(%arg0: i32) -> (i32, i32) {
    %c0_i32 = arith.constant 0 : i32
    %c0_i32_0 = arith.constant 0 : i32
    return %arg0, %c0_i32 : i32, i32
  }
  func.func @transform_1(%arg0: i32) -> (i32, i32) {
    %c0_i32 = arith.constant 0 : i32
    %c0_i32_0 = arith.constant 0 : i32
    %c0_i32_1 = arith.constant 0 : i32
    return %c0_i32, %c0_i32_0 : i32, i32
  }
  func.func @transform_2(%arg0: i32) -> (i32, i32) {
    %c0_i32 = arith.constant 0 : i32
    %c0_i32_0 = arith.constant 0 : i32
    %c0_i32_1 = arith.constant 0 : i32
    return %c0_i32, %c0_i32_0 : i32, i32
  }
  func.func @transform_3(%arg0: i32) -> (i32, i32) {
    %c0_i32 = arith.constant 0 : i32
    %c0_i32_0 = arith.constant 0 : i32
    return %arg0, %c0_i32 : i32, i32
  }
}

</mosaic_0001>

<bundles_post_ra>
// kernel: tpu_custom_call.1
= control target key start
LH: loop header
LB: loop body
LE: loop exit
PB: predicated region body
PF: predicated region fallthrough
CT: control target
= control target key end

     0   :  { %s813_s12 = smov 0   ;;  %s1018_s0 = inlined_call_operand.vmem [shape: f32[512,30], index: 0, kind: input, shape index: {}]   ;;  %s1019_s1 = inlined_call_operand.vmem [shape: f32[30,20], index: 1, kind: input, shape index: {}]   ;;  %s1020_s2 = inlined_call_operand.vmem [shape: f32[1,20], index: 2, kind: input, shape index: {}]   ;;  %s1021_s3 = inlined_call_operand.vmem [shape: f32[512,20], index: 3, kind: output, shape index: {}]  }
   0x1 LB: > { %s632_s13 = sadd.s32 4294967295, %s791_s12   ;;  %p636_p0 = scmp.ge.s32.totalorder %s791_s12, 1  ;;  %s791_s12 = sphi %s813_s12, %s13_s12  }
   0x2   : > { %p138_p1 = scmp.lt.s32.totalorder %s791_s12, 3 }
   0x4   : > { %p139_p2 = pnand %p636_p0, %p138_p1 }
   0x5   : > { %s637_s18 = sshll.u32 (!%p139_p2), %s632_s13, 5 }
   0x6   : > { %142 = sbr.rel (%p139_p2) target bundleno = 247 (0xf7), region = 32  ;;  %p163_p3 = scmp.lt.s32.totalorder (!%p139_p2), %s637_s18, 63 }
   0xb   : > { %v209_v0 = vld [vmem:[%s1019_s1 + $0x18] sm:$0x3f]  ;;  %vm314_vm0 = vcmask 1045504   ;;  %v208_v1 = vld [vmem:[%s1019_s1 + $0x10] sm:$0xff]  ;;  %v207_v2 = vld [vmem:[%s1019_s1 + $0x8] sm:$0xff]  ;;  %s1023_s18 = smov (!%p163_p3, %s637_s18), 63 }
   0xc   : > { %713 = vmatprep.subr.msk.mxu0 %vm314_vm0, %v209_v0  ;;  %769 = vmatprep.subr.msk.mxu1 %vm314_vm0, %v209_v0  ;;  %v206_v3 = vld [vmem:[%s1019_s1] sm:$0xff]  ;;  %s638_s23 = sshll.u32 %s1023_s18, 3  ;;  %vm217_vm1 = vcmask 244736   ;;  %vm543_vm2 = vcmask 162816  }
   0xd   : > { %714 = vmatpush3.msk.msra.mxu0 %vm314_vm0, %v209_v0  ;;  %773 = vmatpush3.msk.msra.mxu1 %vm314_vm0, %v209_v0  ;;  %s841_s26 = scalar_lea.vmem %s1018_s0, %s638_s23  ;;  %v910_v36 = vld [vmem:[%s1020_s2] ss:$0 sm:$0xff]  ;;  %s917_s4 = scalar_lea.vmem %s1021_s3, %s638_s23 }
   0xe   : > { %715 = vmatprep.subr.mxu0 %v208_v1  ;;  %770 = vmatprep.subr.mxu1 %v208_v1  ;;  %v174_v4 = vld [vmem:[%s841_s26] sm:$0xff]  ;;  %v175_v6 = vld [vmem:[%s841_s26 + $0x8] sm:$0xff]  ;;  %v176_v8 = vld [vmem:[%s841_s26 + $0x10] sm:$0xff] }
   0xf   : > { %716 = vmatpush3.msra.mxu0 %v208_v1  ;;  %774 = vmatpush3.msra.mxu1 %v208_v1  ;;  %v190_v5 = vld [vmem:[%s841_s26 + $0x80] sm:$0xff]  ;;  %v191_v7 = vld [vmem:[%s841_s26 + $0x88] sm:$0xff]  ;;  %v192_v9 = vld [vmem:[%s841_s26 + $0x90] sm:$0xff] }
  0x10   : > { %717 = vmatprep.subr.mxu0 %v207_v2  ;;  %771 = vmatprep.subr.mxu1 %v207_v2  ;;  %v177_v10 = vld [vmem:[%s841_s26 + $0x18] sm:$0xff]  ;;  %v178_v12 = vld [vmem:[%s841_s26 + $0x20] sm:$0xff]  ;;  %v179_v14 = vld [vmem:[%s841_s26 + $0x28] sm:$0xff] }
  0x11   : > { %718 = vmatpush3.msra.mxu0 %v207_v2  ;;  %775 = vmatpush3.msra.mxu1 %v207_v2  ;;  %v193_v11 = vld [vmem:[%s841_s26 + $0x98] sm:$0xff]  ;;  %v194_v13 = vld [vmem:[%s841_s26 + $0xa0] sm:$0xff]  ;;  %v195_v15 = vld [vmem:[%s841_s26 + $0xa8] sm:$0xff] }
  0x12   : > { %719 = vmatprep.subr.mxu0 %v206_v3  ;;  %772 = vmatprep.subr.mxu1 %v206_v3  ;;  %v180_v16 = vld [vmem:[%s841_s26 + $0x30] sm:$0xff]  ;;  %v181_v18 = vld [vmem:[%s841_s26 + $0x38] sm:$0xff]  ;;  %v182_v20 = vld [vmem:[%s841_s26 + $0x40] sm:$0xff] }
  0x13   : > { %720 = vmatpush3.msra.mxu0 %v206_v3  ;;  %776 = vmatpush3.msra.mxu1 %v206_v3  ;;  %v196_v17 = vld [vmem:[%s841_s26 + $0xb0] sm:$0xff]  ;;  %v197_v19 = vld [vmem:[%s841_s26 + $0xb8] sm:$0xff]  ;;  %v198_v21 = vld [vmem:[%s841_s26 + $0xc0] sm:$0xff] }
  0x14   : > { %721 = vmatprep.mubr.msk.f32.mxu0 %vm217_vm1, %v174_v4  ;;  %745 = vmatprep.mubr.msk.f32.mxu1 %vm217_vm1, %v190_v5  ;;  %v183_v22 = vld [vmem:[%s841_s26 + $0x48] sm:$0xff]  ;;  %v184_v24 = vld [vmem:[%s841_s26 + $0x50] sm:$0xff]  ;;  %v185_v26 = vld [vmem:[%s841_s26 + $0x58] sm:$0xff] }
  0x15   : > { %722 = vmatmul.mubr.msk.f32.vlgmr.msra.gmra.mxu0 %vm217_vm1, %v175_v6  ;;  %746 = vmatmul.mubr.msk.f32.vlgmr.msra.gmra.mxu1 %vm217_vm1, %v191_v7  ;;  %v199_v23 = vld [vmem:[%s841_s26 + $0xc8] sm:$0xff]  ;;  %v200_v25 = vld [vmem:[%s841_s26 + $0xd0] sm:$0xff]  ;;  %v201_v27 = vld [vmem:[%s841_s26 + $0xd8] sm:$0xff] }
  0x16   : > { %724 = vmatprep.mubr.msk.f32.mxu0 %vm217_vm1, %v176_v8  ;;  %748 = vmatprep.mubr.msk.f32.mxu1 %vm217_vm1, %v192_v9  ;;  %v186_v28 = vld [vmem:[%s841_s26 + $0x60] sm:$0xff]  ;;  %v187_v30 = vld [vmem:[%s841_s26 + $0x68] sm:$0xff]  ;;  %v188_v32 = vld [vmem:[%s841_s26 + $0x70] sm:$0xff] }
  0x17   : > { %v202_v29 = vld [vmem:[%s841_s26 + $0xe0] sm:$0xff]  ;;  %v203_v31 = vld [vmem:[%s841_s26 + $0xe8] sm:$0xff]  ;;  %v204_v33 = vld [vmem:[%s841_s26 + $0xf0] sm:$0xff] }
  0x18   : > { %v189_v34 = vld [vmem:[%s841_s26 + $0x78] sm:$0xff] }
  0x19   : > { %725 = vmatmul.mubr.msk.f32.gmra.mxu0 %vm217_vm1, %v177_v10  ;;  %749 = vmatmul.mubr.msk.f32.gmra.mxu1 %vm217_vm1, %v193_v11  ;;  %v205_v35 = vld [vmem:[%s841_s26 + $0xf8] sm:$0xff] }
  0x1a   : > { %727 = vmatprep.mubr.msk.f32.mxu0 %vm217_vm1, %v178_v12  ;;  %751 = vmatprep.mubr.msk.f32.mxu1 %vm217_vm1, %v194_v13 }
  0x1d   : > { %728 = vmatmul.mubr.msk.f32.gmra.mxu0 %vm217_vm1, %v179_v14  ;;  %752 = vmatmul.mubr.msk.f32.gmra.mxu1 %vm217_vm1, %v195_v15 }
  0x1e   : > { %730 = vmatprep.mubr.msk.f32.mxu0 %vm217_vm1, %v180_v16  ;;  %754 = vmatprep.mubr.msk.f32.mxu1 %vm217_vm1, %v196_v17 }
  0x21   : > { %731 = vmatmul.mubr.msk.f32.gmra.mxu0 %vm217_vm1, %v181_v18  ;;  %755 = vmatmul.mubr.msk.f32.gmra.mxu1 %vm217_vm1, %v197_v19 }
  0x22   : > { %733 = vmatprep.mubr.msk.f32.mxu0 %vm217_vm1, %v182_v20  ;;  %757 = vmatprep.mubr.msk.f32.mxu1 %vm217_vm1, %v198_v21 }
  0x25   : > { %734 = vmatmul.mubr.msk.f32.gmra.mxu0 %vm217_vm1, %v183_v22  ;;  %758 = vmatmul.mubr.msk.f32.gmra.mxu1 %vm217_vm1, %v199_v23 }
  0x26   : > { %736 = vmatprep.mubr.msk.f32.mxu0 %vm217_vm1, %v184_v24  ;;  %760 = vmatprep.mubr.msk.f32.mxu1 %vm217_vm1, %v200_v25 }
  0x29   : > { %737 = vmatmul.mubr.msk.f32.gmra.mxu0 %vm217_vm1, %v185_v26  ;;  %761 = vmatmul.mubr.msk.f32.gmra.mxu1 %vm217_vm1, %v201_v27 }
  0x2a   : > { %739 = vmatprep.mubr.msk.f32.mxu0 %vm217_vm1, %v186_v28  ;;  %763 = vmatprep.mubr.msk.f32.mxu1 %vm217_vm1, %v202_v29 }
  0x2d   : > { %740 = vmatmul.mubr.msk.f32.gmra.mxu0 %vm217_vm1, %v187_v30  ;;  %764 = vmatmul.mubr.msk.f32.gmra.mxu1 %vm217_vm1, %v203_v31 }
  0x2e   : > { %742 = vmatprep.mubr.msk.f32.mxu0 %vm217_vm1, %v188_v32  ;;  %766 = vmatprep.mubr.msk.f32.mxu1 %vm217_vm1, %v204_v33 }
  0x31   : > { %743 = vmatmul.mubr.msk.f32.gmra.mxu0 %vm217_vm1, %v189_v34  ;;  %767 = vmatmul.mubr.msk.f32.gmra.mxu1 %vm217_vm1, %v205_v35 }
  0xd5   : > { %v723_v37 = vpop.f32.mrf.mxu0  ;;  %v747_v38 = vpop.f32.mrf.mxu1 }
  0xd6   : > { %v390_v39 = vadd.f32 %v723_v37, %v910_v36  ;;  %v470_v40 = vadd.f32 %v747_v38, %v910_v36 }
  0xd7   : > { %v384_v41 = vpop.f32.mrf.mxu0  ;;  %v464_v42 = vpop.f32.mrf.mxu1 }
  0xd8   : > { %545 = vst.msk [vmem:[%s917_s4 + $0x8] sm:$0xff] %vm543_vm2, %v390_v39  ;;  %561 = vst.msk [vmem:[%s917_s4 + $0x88] sm:$0xff] %vm543_vm2, %v470_v40  ;;  %v385_v43 = vadd.f32 %v910_v36, %v384_v41  ;;  %v465_v44 = vadd.f32 %v910_v36, %v464_v42 }
  0xd9   : > { %v726_v45 = vpop.f32.mrf.mxu0  ;;  %v750_v46 = vpop.f32.mrf.mxu1 }
  0xda   : > { %544 = vst.msk [vmem:[%s917_s4] sm:$0xff] %vm543_vm2, %v385_v43  ;;  %560 = vst.msk [vmem:[%s917_s4 + $0x80] sm:$0xff] %vm543_vm2, %v465_v44  ;;  %v400_v47 = vadd.f32 %v726_v45, %v910_v36  ;;  %v480_v48 = vadd.f32 %v750_v46, %v910_v36 }
  0xdb   : > { %v394_v49 = vpop.f32.mrf.mxu0  ;;  %v474_v50 = vpop.f32.mrf.mxu1 }
  0xdc   : > { %547 = vst.msk [vmem:[%s917_s4 + $0x18] sm:$0xff] %vm543_vm2, %v400_v47  ;;  %563 = vst.msk [vmem:[%s917_s4 + $0x98] sm:$0xff] %vm543_vm2, %v480_v48  ;;  %v395_v51 = vadd.f32 %v910_v36, %v394_v49  ;;  %v475_v52 = vadd.f32 %v910_v36, %v474_v50 }
  0xdd   : > { %v729_v53 = vpop.f32.mrf.mxu0  ;;  %v753_v54 = vpop.f32.mrf.mxu1 }
  0xde   : > { %546 = vst.msk [vmem:[%s917_s4 + $0x10] sm:$0xff] %vm543_vm2, %v395_v51  ;;  %562 = vst.msk [vmem:[%s917_s4 + $0x90] sm:$0xff] %vm543_vm2, %v475_v52  ;;  %v410_v55 = vadd.f32 %v729_v53, %v910_v36  ;;  %v490_v56 = vadd.f32 %v753_v54, %v910_v36 }
  0xdf   : > { %v404_v57 = vpop.f32.mrf.mxu0  ;;  %v484_v58 = vpop.f32.mrf.mxu1 }
  0xe0   : > { %549 = vst.msk [vmem:[%s917_s4 + $0x28] sm:$0xff] %vm543_vm2, %v410_v55  ;;  %565 = vst.msk [vmem:[%s917_s4 + $0xa8] sm:$0xff] %vm543_vm2, %v490_v56  ;;  %v405_v59 = vadd.f32 %v910_v36, %v404_v57  ;;  %v485_v60 = vadd.f32 %v910_v36, %v484_v58 }
  0xe1   : > { %v732_v61 = vpop.f32.mrf.mxu0  ;;  %v756_v62 = vpop.f32.mrf.mxu1 }
  0xe2   : > { %548 = vst.msk [vmem:[%s917_s4 + $0x20] sm:$0xff] %vm543_vm2, %v405_v59  ;;  %564 = vst.msk [vmem:[%s917_s4 + $0xa0] sm:$0xff] %vm543_vm2, %v485_v60  ;;  %v420_v63 = vadd.f32 %v732_v61, %v910_v36  ;;  %v500_v0 = vadd.f32 %v756_v62, %v910_v36 }
  0xe3   : > { %v414_v1 = vpop.f32.mrf.mxu0  ;;  %v494_v2 = vpop.f32.mrf.mxu1 }
  0xe4   : > { %551 = vst.msk [vmem:[%s917_s4 + $0x38] sm:$0xff] %vm543_vm2, %v420_v63  ;;  %567 = vst.msk [vmem:[%s917_s4 + $0xb8] sm:$0xff] %vm543_vm2, %v500_v0  ;;  %v415_v3 = vadd.f32 %v910_v36, %v414_v1  ;;  %v495_v4 = vadd.f32 %v910_v36, %v494_v2 }
  0xe5   : > { %v735_v5 = vpop.f32.mrf.mxu0  ;;  %v759_v6 = vpop.f32.mrf.mxu1 }
  0xe6   : > { %550 = vst.msk [vmem:[%s917_s4 + $0x30] sm:$0xff] %vm543_vm2, %v415_v3  ;;  %566 = vst.msk [vmem:[%s917_s4 + $0xb0] sm:$0xff] %vm543_vm2, %v495_v4  ;;  %v430_v7 = vadd.f32 %v735_v5, %v910_v36  ;;  %v510_v8 = vadd.f32 %v759_v6, %v910_v36 }
  0xe7   : > { %v424_v9 = vpop.f32.mrf.mxu0  ;;  %v504_v10 = vpop.f32.mrf.mxu1 }
  0xe8   : > { %553 = vst.msk [vmem:[%s917_s4 + $0x48] sm:$0xff] %vm543_vm2, %v430_v7  ;;  %569 = vst.msk [vmem:[%s917_s4 + $0xc8] sm:$0xff] %vm543_vm2, %v510_v8  ;;  %v425_v11 = vadd.f32 %v910_v36, %v424_v9  ;;  %v505_v12 = vadd.f32 %v910_v36, %v504_v10 }
  0xe9   : > { %v738_v13 = vpop.f32.mrf.mxu0  ;;  %v762_v14 = vpop.f32.mrf.mxu1 }
  0xea   : > { %552 = vst.msk [vmem:[%s917_s4 + $0x40] sm:$0xff] %vm543_vm2, %v425_v11  ;;  %568 = vst.msk [vmem:[%s917_s4 + $0xc0] sm:$0xff] %vm543_vm2, %v505_v12  ;;  %v440_v15 = vadd.f32 %v738_v13, %v910_v36  ;;  %v520_v16 = vadd.f32 %v762_v14, %v910_v36 }
  0xeb   : > { %v434_v17 = vpop.f32.mrf.mxu0  ;;  %v514_v18 = vpop.f32.mrf.mxu1 }
  0xec   : > { %555 = vst.msk [vmem:[%s917_s4 + $0x58] sm:$0xff] %vm543_vm2, %v440_v15  ;;  %571 = vst.msk [vmem:[%s917_s4 + $0xd8] sm:$0xff] %vm543_vm2, %v520_v16  ;;  %v435_v19 = vadd.f32 %v910_v36, %v434_v17  ;;  %v515_v20 = vadd.f32 %v910_v36, %v514_v18 }
  0xed   : > { %v741_v21 = vpop.f32.mrf.mxu0  ;;  %v765_v22 = vpop.f32.mrf.mxu1 }
  0xee   : > { %554 = vst.msk [vmem:[%s917_s4 + $0x50] sm:$0xff] %vm543_vm2, %v435_v19  ;;  %570 = vst.msk [vmem:[%s917_s4 + $0xd0] sm:$0xff] %vm543_vm2, %v515_v20  ;;  %v450_v23 = vadd.f32 %v741_v21, %v910_v36  ;;  %v530_v24 = vadd.f32 %v765_v22, %v910_v36 }
  0xef   : > { %v444_v25 = vpop.f32.mrf.mxu0  ;;  %v524_v26 = vpop.f32.mrf.mxu1 }
  0xf0   : > { %557 = vst.msk [vmem:[%s917_s4 + $0x68] sm:$0xff] %vm543_vm2, %v450_v23  ;;  %573 = vst.msk [vmem:[%s917_s4 + $0xe8] sm:$0xff] %vm543_vm2, %v530_v24  ;;  %v445_v27 = vadd.f32 %v910_v36, %v444_v25  ;;  %v525_v28 = vadd.f32 %v910_v36, %v524_v26 }
  0xf1   : > { %v744_v29 = vpop.f32.mrf.mxu0  ;;  %v768_v30 = vpop.f32.mrf.mxu1 }
  0xf2   : > { %556 = vst.msk [vmem:[%s917_s4 + $0x60] sm:$0xff] %vm543_vm2, %v445_v27  ;;  %572 = vst.msk [vmem:[%s917_s4 + $0xe0] sm:$0xff] %vm543_vm2, %v525_v28  ;;  %v460_v31 = vadd.f32 %v744_v29, %v910_v36  ;;  %v540_v32 = vadd.f32 %v768_v30, %v910_v36 }
  0xf3   : > { %v454_v33 = vpop.f32.mrf.mxu0  ;;  %v534_v34 = vpop.f32.mrf.mxu1 }
  0xf4   : > { %559 = vst.msk [vmem:[%s917_s4 + $0x78] sm:$0xff] %vm543_vm2, %v460_v31  ;;  %575 = vst.msk [vmem:[%s917_s4 + $0xf8] sm:$0xff] %vm543_vm2, %v540_v32  ;;  %v455_v35 = vadd.f32 %v910_v36, %v454_v33  ;;  %v535_v37 = vadd.f32 %v910_v36, %v534_v34 }
  0xf6   : > { %558 = vst.msk [vmem:[%s917_s4 + $0x70] sm:$0xff] %vm543_vm2, %v455_v35  ;;  %574 = vst.msk [vmem:[%s917_s4 + $0xf0] sm:$0xff] %vm543_vm2, %v535_v37 }
  0xf7 PF: > { %s13_s12 = sadd.s32 1, %s791_s12  }
  0xf8   : > { %p10_p4 = scmp.ge.s32.totalorder %s13_s12, 4  }
  0xfa   :  { %12 = sbr.rel (!%p10_p4) target bundleno = 1 (0x1), region = 62 }

// kernel: tpu_custom_call.1
= control target key start
LH: loop header
LB: loop body
LE: loop exit
PB: predicated region body
PF: predicated region fallthrough
CT: control target
= control target key end

     0   :  { %s813_s12 = smov 0   ;;  %s1018_s0 = inlined_call_operand.vmem [shape: f32[512,30], index: 0, kind: input, shape index: {}]   ;;  %s1019_s1 = inlined_call_operand.vmem [shape: f32[30,20], index: 1, kind: input, shape index: {}]   ;;  %s1020_s2 = inlined_call_operand.vmem [shape: f32[1,20], index: 2, kind: input, shape index: {}]   ;;  %s1021_s3 = inlined_call_operand.vmem [shape: f32[512,20], index: 3, kind: output, shape index: {}]  }
   0x1 LB: > { %s632_s13 = sadd.s32 4294967295, %s791_s12   ;;  %p636_p0 = scmp.ge.s32.totalorder %s791_s12, 1  ;;  %s791_s12 = sphi %s813_s12, %s13_s12  }
   0x2   : > { %p138_p1 = scmp.lt.s32.totalorder %s791_s12, 3 }
   0x4   : > { %p139_p2 = pnand %p636_p0, %p138_p1 }
   0x5   : > { %s637_s18 = sshll.u32 (!%p139_p2), %s632_s13, 5 }
   0x6   : > { %142 = sbr.rel (%p139_p2) target bundleno = 247 (0xf7), region = 32  ;;  %p163_p3 = scmp.lt.s32.totalorder (!%p139_p2), %s637_s18, 63 }
   0xb   : > { %v209_v0 = vld [vmem:[%s1019_s1 + $0x18] sm:$0x3f]  ;;  %vm314_vm0 = vcmask 1045504   ;;  %v208_v1 = vld [vmem:[%s1019_s1 + $0x10] sm:$0xff]  ;;  %v207_v2 = vld [vmem:[%s1019_s1 + $0x8] sm:$0xff]  ;;  %s1023_s18 = smov (!%p163_p3, %s637_s18), 63 }
   0xc   : > { %713 = vmatprep.subr.msk.mxu0 %vm314_vm0, %v209_v0  ;;  %769 = vmatprep.subr.msk.mxu1 %vm314_vm0, %v209_v0  ;;  %v206_v3 = vld [vmem:[%s1019_s1] sm:$0xff]  ;;  %s638_s23 = sshll.u32 %s1023_s18, 3  ;;  %vm217_vm1 = vcmask 244736   ;;  %vm543_vm2 = vcmask 162816  }
   0xd   : > { %714 = vmatpush3.msk.msra.mxu0 %vm314_vm0, %v209_v0  ;;  %773 = vmatpush3.msk.msra.mxu1 %vm314_vm0, %v209_v0  ;;  %s841_s26 = scalar_lea.vmem %s1018_s0, %s638_s23  ;;  %v910_v36 = vld [vmem:[%s1020_s2] ss:$0 sm:$0xff]  ;;  %s917_s4 = scalar_lea.vmem %s1021_s3, %s638_s23 }
   0xe   : > { %715 = vmatprep.subr.mxu0 %v208_v1  ;;  %770 = vmatprep.subr.mxu1 %v208_v1  ;;  %v174_v4 = vld [vmem:[%s841_s26] sm:$0xff]  ;;  %v175_v6 = vld [vmem:[%s841_s26 + $0x8] sm:$0xff]  ;;  %v176_v8 = vld [vmem:[%s841_s26 + $0x10] sm:$0xff] }
   0xf   : > { %716 = vmatpush3.msra.mxu0 %v208_v1  ;;  %774 = vmatpush3.msra.mxu1 %v208_v1  ;;  %v190_v5 = vld [vmem:[%s841_s26 + $0x80] sm:$0xff]  ;;  %v191_v7 = vld [vmem:[%s841_s26 + $0x88] sm:$0xff]  ;;  %v192_v9 = vld [vmem:[%s841_s26 + $0x90] sm:$0xff] }
  0x10   : > { %717 = vmatprep.subr.mxu0 %v207_v2  ;;  %771 = vmatprep.subr.mxu1 %v207_v2  ;;  %v177_v10 = vld [vmem:[%s841_s26 + $0x18] sm:$0xff]  ;;  %v178_v12 = vld [vmem:[%s841_s26 + $0x20] sm:$0xff]  ;;  %v179_v14 = vld [vmem:[%s841_s26 + $0x28] sm:$0xff] }
  0x11   : > { %718 = vmatpush3.msra.mxu0 %v207_v2  ;;  %775 = vmatpush3.msra.mxu1 %v207_v2  ;;  %v193_v11 = vld [vmem:[%s841_s26 + $0x98] sm:$0xff]  ;;  %v194_v13 = vld [vmem:[%s841_s26 + $0xa0] sm:$0xff]  ;;  %v195_v15 = vld [vmem:[%s841_s26 + $0xa8] sm:$0xff] }
  0x12   : > { %719 = vmatprep.subr.mxu0 %v206_v3  ;;  %772 = vmatprep.subr.mxu1 %v206_v3  ;;  %v180_v16 = vld [vmem:[%s841_s26 + $0x30] sm:$0xff]  ;;  %v181_v18 = vld [vmem:[%s841_s26 + $0x38] sm:$0xff]  ;;  %v182_v20 = vld [vmem:[%s841_s26 + $0x40] sm:$0xff] }
  0x13   : > { %720 = vmatpush3.msra.mxu0 %v206_v3  ;;  %776 = vmatpush3.msra.mxu1 %v206_v3  ;;  %v196_v17 = vld [vmem:[%s841_s26 + $0xb0] sm:$0xff]  ;;  %v197_v19 = vld [vmem:[%s841_s26 + $0xb8] sm:$0xff]  ;;  %v198_v21 = vld [vmem:[%s841_s26 + $0xc0] sm:$0xff] }
  0x14   : > { %721 = vmatprep.mubr.msk.f32.mxu0 %vm217_vm1, %v174_v4  ;;  %745 = vmatprep.mubr.msk.f32.mxu1 %vm217_vm1, %v190_v5  ;;  %v183_v22 = vld [vmem:[%s841_s26 + $0x48] sm:$0xff]  ;;  %v184_v24 = vld [vmem:[%s841_s26 + $0x50] sm:$0xff]  ;;  %v185_v26 = vld [vmem:[%s841_s26 + $0x58] sm:$0xff] }
  0x15   : > { %722 = vmatmul.mubr.msk.f32.vlgmr.msra.gmra.mxu0 %vm217_vm1, %v175_v6  ;;  %746 = vmatmul.mubr.msk.f32.vlgmr.msra.gmra.mxu1 %vm217_vm1, %v191_v7  ;;  %v199_v23 = vld [vmem:[%s841_s26 + $0xc8] sm:$0xff]  ;;  %v200_v25 = vld [vmem:[%s841_s26 + $0xd0] sm:$0xff]  ;;  %v201_v27 = vld [vmem:[%s841_s26 + $0xd8] sm:$0xff] }
  0x16   : > { %724 = vmatprep.mubr.msk.f32.mxu0 %vm217_vm1, %v176_v8  ;;  %748 = vmatprep.mubr.msk.f32.mxu1 %vm217_vm1, %v192_v9  ;;  %v186_v28 = vld [vmem:[%s841_s26 + $0x60] sm:$0xff]  ;;  %v187_v30 = vld [vmem:[%s841_s26 + $0x68] sm:$0xff]  ;;  %v188_v32 = vld [vmem:[%s841_s26 + $0x70] sm:$0xff] }
  0x17   : > { %v202_v29 = vld [vmem:[%s841_s26 + $0xe0] sm:$0xff]  ;;  %v203_v31 = vld [vmem:[%s841_s26 + $0xe8] sm:$0xff]  ;;  %v204_v33 = vld [vmem:[%s841_s26 + $0xf0] sm:$0xff] }
  0x18   : > { %v189_v34 = vld [vmem:[%s841_s26 + $0x78] sm:$0xff] }
  0x19   : > { %725 = vmatmul.mubr.msk.f32.gmra.mxu0 %vm217_vm1, %v177_v10  ;;  %749 = vmatmul.mubr.msk.f32.gmra.mxu1 %vm217_vm1, %v193_v11  ;;  %v205_v35 = vld [vmem:[%s841_s26 + $0xf8] sm:$0xff] }
  0x1a   : > { %727 = vmatprep.mubr.msk.f32.mxu0 %vm217_vm1, %v178_v12  ;;  %751 = vmatprep.mubr.msk.f32.mxu1 %vm217_vm1, %v194_v13 }
  0x1d   : > { %728 = vmatmul.mubr.msk.f32.gmra.mxu0 %vm217_vm1, %v179_v14  ;;  %752 = vmatmul.mubr.msk.f32.gmra.mxu1 %vm217_vm1, %v195_v15 }
  0x1e   : > { %730 = vmatprep.mubr.msk.f32.mxu0 %vm217_vm1, %v180_v16  ;;  %754 = vmatprep.mubr.msk.f32.mxu1 %vm217_vm1, %v196_v17 }
  0x21   : > { %731 = vmatmul.mubr.msk.f32.gmra.mxu0 %vm217_vm1, %v181_v18  ;;  %755 = vmatmul.mubr.msk.f32.gmra.mxu1 %vm217_vm1, %v197_v19 }
  0x22   : > { %733 = vmatprep.mubr.msk.f32.mxu0 %vm217_vm1, %v182_v20  ;;  %757 = vmatprep.mubr.msk.f32.mxu1 %vm217_vm1, %v198_v21 }
  0x25   : > { %734 = vmatmul.mubr.msk.f32.gmra.mxu0 %vm217_vm1, %v183_v22  ;;  %758 = vmatmul.mubr.msk.f32.gmra.mxu1 %vm217_vm1, %v199_v23 }
  0x26   : > { %736 = vmatprep.mubr.msk.f32.mxu0 %vm217_vm1, %v184_v24  ;;  %760 = vmatprep.mubr.msk.f32.mxu1 %vm217_vm1, %v200_v25 }
  0x29   : > { %737 = vmatmul.mubr.msk.f32.gmra.mxu0 %vm217_vm1, %v185_v26  ;;  %761 = vmatmul.mubr.msk.f32.gmra.mxu1 %vm217_vm1, %v201_v27 }
  0x2a   : > { %739 = vmatprep.mubr.msk.f32.mxu0 %vm217_vm1, %v186_v28  ;;  %763 = vmatprep.mubr.msk.f32.mxu1 %vm217_vm1, %v202_v29 }
  0x2d   : > { %740 = vmatmul.mubr.msk.f32.gmra.mxu0 %vm217_vm1, %v187_v30  ;;  %764 = vmatmul.mubr.msk.f32.gmra.mxu1 %vm217_vm1, %v203_v31 }
  0x2e   : > { %742 = vmatprep.mubr.msk.f32.mxu0 %vm217_vm1, %v188_v32  ;;  %766 = vmatprep.mubr.msk.f32.mxu1 %vm217_vm1, %v204_v33 }
  0x31   : > { %743 = vmatmul.mubr.msk.f32.gmra.mxu0 %vm217_vm1, %v189_v34  ;;  %767 = vmatmul.mubr.msk.f32.gmra.mxu1 %vm217_vm1, %v205_v35 }
  0xd5   : > { %v723_v37 = vpop.f32.mrf.mxu0  ;;  %v747_v38 = vpop.f32.mrf.mxu1 }
  0xd6   : > { %v390_v39 = vadd.f32 %v723_v37, %v910_v36  ;;  %v470_v40 = vadd.f32 %v747_v38, %v910_v36 }
  0xd7   : > { %v384_v41 = vpop.f32.mrf.mxu0  ;;  %v464_v42 = vpop.f32.mrf.mxu1 }
  0xd8   : > { %545 = vst.msk [vmem:[%s917_s4 + $0x8] sm:$0xff] %vm543_vm2, %v390_v39  ;;  %561 = vst.msk [vmem:[%s917_s4 + $0x88] sm:$0xff] %vm543_vm2, %v470_v40  ;;  %v385_v43 = vadd.f32 %v910_v36, %v384_v41  ;;  %v465_v44 = vadd.f32 %v910_v36, %v464_v42 }
  0xd9   : > { %v726_v45 = vpop.f32.mrf.mxu0  ;;  %v750_v46 = vpop.f32.mrf.mxu1 }
  0xda   : > { %544 = vst.msk [vmem:[%s917_s4] sm:$0xff] %vm543_vm2, %v385_v43  ;;  %560 = vst.msk [vmem:[%s917_s4 + $0x80] sm:$0xff] %vm543_vm2, %v465_v44  ;;  %v400_v47 = vadd.f32 %v726_v45, %v910_v36  ;;  %v480_v48 = vadd.f32 %v750_v46, %v910_v36 }
  0xdb   : > { %v394_v49 = vpop.f32.mrf.mxu0  ;;  %v474_v50 = vpop.f32.mrf.mxu1 }
  0xdc   : > { %547 = vst.msk [vmem:[%s917_s4 + $0x18] sm:$0xff] %vm543_vm2, %v400_v47  ;;  %563 = vst.msk [vmem:[%s917_s4 + $0x98] sm:$0xff] %vm543_vm2, %v480_v48  ;;  %v395_v51 = vadd.f32 %v910_v36, %v394_v49  ;;  %v475_v52 = vadd.f32 %v910_v36, %v474_v50 }
  0xdd   : > { %v729_v53 = vpop.f32.mrf.mxu0  ;;  %v753_v54 = vpop.f32.mrf.mxu1 }
  0xde   : > { %546 = vst.msk [vmem:[%s917_s4 + $0x10] sm:$0xff] %vm543_vm2, %v395_v51  ;;  %562 = vst.msk [vmem:[%s917_s4 + $0x90] sm:$0xff] %vm543_vm2, %v475_v52  ;;  %v410_v55 = vadd.f32 %v729_v53, %v910_v36  ;;  %v490_v56 = vadd.f32 %v753_v54, %v910_v36 }
  0xdf   : > { %v404_v57 = vpop.f32.mrf.mxu0  ;;  %v484_v58 = vpop.f32.mrf.mxu1 }
  0xe0   : > { %549 = vst.msk [vmem:[%s917_s4 + $0x28] sm:$0xff] %vm543_vm2, %v410_v55  ;;  %565 = vst.msk [vmem:[%s917_s4 + $0xa8] sm:$0xff] %vm543_vm2, %v490_v56  ;;  %v405_v59 = vadd.f32 %v910_v36, %v404_v57  ;;  %v485_v60 = vadd.f32 %v910_v36, %v484_v58 }
  0xe1   : > { %v732_v61 = vpop.f32.mrf.mxu0  ;;  %v756_v62 = vpop.f32.mrf.mxu1 }
  0xe2   : > { %548 = vst.msk [vmem:[%s917_s4 + $0x20] sm:$0xff] %vm543_vm2, %v405_v59  ;;  %564 = vst.msk [vmem:[%s917_s4 + $0xa0] sm:$0xff] %vm543_vm2, %v485_v60  ;;  %v420_v63 = vadd.f32 %v732_v61, %v910_v36  ;;  %v500_v0 = vadd.f32 %v756_v62, %v910_v36 }
  0xe3   : > { %v414_v1 = vpop.f32.mrf.mxu0  ;;  %v494_v2 = vpop.f32.mrf.mxu1 }
  0xe4   : > { %551 = vst.msk [vmem:[%s917_s4 + $0x38] sm:$0xff] %vm543_vm2, %v420_v63  ;;  %567 = vst.msk [vmem:[%s917_s4 + $0xb8] sm:$0xff] %vm543_vm2, %v500_v0  ;;  %v415_v3 = vadd.f32 %v910_v36, %v414_v1  ;;  %v495_v4 = vadd.f32 %v910_v36, %v494_v2 }
  0xe5   : > { %v735_v5 = vpop.f32.mrf.mxu0  ;;  %v759_v6 = vpop.f32.mrf.mxu1 }
  0xe6   : > { %550 = vst.msk [vmem:[%s917_s4 + $0x30] sm:$0xff] %vm543_vm2, %v415_v3  ;;  %566 = vst.msk [vmem:[%s917_s4 + $0xb0] sm:$0xff] %vm543_vm2, %v495_v4  ;;  %v430_v7 = vadd.f32 %v735_v5, %v910_v36  ;;  %v510_v8 = vadd.f32 %v759_v6, %v910_v36 }
  0xe7   : > { %v424_v9 = vpop.f32.mrf.mxu0  ;;  %v504_v10 = vpop.f32.mrf.mxu1 }
  0xe8   : > { %553 = vst.msk [vmem:[%s917_s4 + $0x48] sm:$0xff] %vm543_vm2, %v430_v7  ;;  %569 = vst.msk [vmem:[%s917_s4 + $0xc8] sm:$0xff] %vm543_vm2, %v510_v8  ;;  %v425_v11 = vadd.f32 %v910_v36, %v424_v9  ;;  %v505_v12 = vadd.f32 %v910_v36, %v504_v10 }
  0xe9   : > { %v738_v13 = vpop.f32.mrf.mxu0  ;;  %v762_v14 = vpop.f32.mrf.mxu1 }
  0xea   : > { %552 = vst.msk [vmem:[%s917_s4 + $0x40] sm:$0xff] %vm543_vm2, %v425_v11  ;;  %568 = vst.msk [vmem:[%s917_s4 + $0xc0] sm:$0xff] %vm543_vm2, %v505_v12  ;;  %v440_v15 = vadd.f32 %v738_v13, %v910_v36  ;;  %v520_v16 = vadd.f32 %v762_v14, %v910_v36 }
  0xeb   : > { %v434_v17 = vpop.f32.mrf.mxu0  ;;  %v514_v18 = vpop.f32.mrf.mxu1 }
  0xec   : > { %555 = vst.msk [vmem:[%s917_s4 + $0x58] sm:$0xff] %vm543_vm2, %v440_v15  ;;  %571 = vst.msk [vmem:[%s917_s4 + $0xd8] sm:$0xff] %vm543_vm2, %v520_v16  ;;  %v435_v19 = vadd.f32 %v910_v36, %v434_v17  ;;  %v515_v20 = vadd.f32 %v910_v36, %v514_v18 }
  0xed   : > { %v741_v21 = vpop.f32.mrf.mxu0  ;;  %v765_v22 = vpop.f32.mrf.mxu1 }
  0xee   : > { %554 = vst.msk [vmem:[%s917_s4 + $0x50] sm:$0xff] %vm543_vm2, %v435_v19  ;;  %570 = vst.msk [vmem:[%s917_s4 + $0xd0] sm:$0xff] %vm543_vm2, %v515_v20  ;;  %v450_v23 = vadd.f32 %v741_v21, %v910_v36  ;;  %v530_v24 = vadd.f32 %v765_v22, %v910_v36 }
  0xef   : > { %v444_v25 = vpop.f32.mrf.mxu0  ;;  %v524_v26 = vpop.f32.mrf.mxu1 }
  0xf0   : > { %557 = vst.msk [vmem:[%s917_s4 + $0x68] sm:$0xff] %vm543_vm2, %v450_v23  ;;  %573 = vst.msk [vmem:[%s917_s4 + $0xe8] sm:$0xff] %vm543_vm2, %v530_v24  ;;  %v445_v27 = vadd.f32 %v910_v36, %v444_v25  ;;  %v525_v28 = vadd.f32 %v910_v36, %v524_v26 }
  0xf1   : > { %v744_v29 = vpop.f32.mrf.mxu0  ;;  %v768_v30 = vpop.f32.mrf.mxu1 }
  0xf2   : > { %556 = vst.msk [vmem:[%s917_s4 + $0x60] sm:$0xff] %vm543_vm2, %v445_v27  ;;  %572 = vst.msk [vmem:[%s917_s4 + $0xe0] sm:$0xff] %vm543_vm2, %v525_v28  ;;  %v460_v31 = vadd.f32 %v744_v29, %v910_v36  ;;  %v540_v32 = vadd.f32 %v768_v30, %v910_v36 }
  0xf3   : > { %v454_v33 = vpop.f32.mrf.mxu0  ;;  %v534_v34 = vpop.f32.mrf.mxu1 }
  0xf4   : > { %559 = vst.msk [vmem:[%s917_s4 + $0x78] sm:$0xff] %vm543_vm2, %v460_v31  ;;  %575 = vst.msk [vmem:[%s917_s4 + $0xf8] sm:$0xff] %vm543_vm2, %v540_v32  ;;  %v455_v35 = vadd.f32 %v910_v36, %v454_v33  ;;  %v535_v37 = vadd.f32 %v910_v36, %v534_v34 }
  0xf6   : > { %558 = vst.msk [vmem:[%s917_s4 + $0x70] sm:$0xff] %vm543_vm2, %v455_v35  ;;  %574 = vst.msk [vmem:[%s917_s4 + $0xf0] sm:$0xff] %vm543_vm2, %v535_v37 }
  0xf7 PF: > { %s13_s12 = sadd.s32 1, %s791_s12  }
  0xf8   : > { %p10_p4 = scmp.ge.s32.totalorder %s13_s12, 4  }
  0xfa   :  { %12 = sbr.rel (!%p10_p4) target bundleno = 1 (0x1), region = 62 }

</bundles_post_ra>
